<compile_context>
chip_gen: v6e
topology: v6e:2x2x1
jax: 0.10.0
libtpu: 0.0.40
codegen_flags: <defaults>
</compile_context>

<pallas_src>
import functools

import jax
import jax.numpy as jnp
from jax import lax
from jax.experimental import pallas as pl
from jax.experimental.pallas import tpu as pltpu

HIDDEN1 = 50
HIDDEN2 = 100
LANE = 128
SUBLANE = 8


def _round_up(n, m):
    return ((n + m - 1) // m) * m


def _mlp(x, w1_ref, b1_ref, w2_ref, b2_ref, w3_ref, b3_ref):
    """Fused fc1->ReLU->fc2->ReLU->out on one (tb, S) batch tile.
    Matmuls accumulate in f32 on the MXU; bias add / ReLU are f32 VPU ops."""
    h1 = jnp.dot(x, w1_ref[...], preferred_element_type=jnp.float32) + b1_ref[...]
    h1 = jnp.maximum(h1, 0.0).astype(x.dtype)
    h2 = jnp.dot(h1, w2_ref[...], preferred_element_type=jnp.float32) + b2_ref[...]
    h2 = jnp.maximum(h2, 0.0).astype(x.dtype)
    return jnp.dot(h2, w3_ref[...], preferred_element_type=jnp.float32) + b3_ref[...]


def dnn_sarsa_kernel(x_ref, w1_ref, b1_ref, w2_ref, b2_ref, w3_ref, b3_ref, o_ref):
    out = _mlp(x_ref[...], w1_ref, b1_ref, w2_ref, b2_ref, w3_ref, b3_ref)
    o_ref[...] = out.astype(o_ref.dtype)


def dnn_sarsa_greedy_kernel(x_ref, w1_ref, b1_ref, w2_ref, b2_ref, w3_ref, b3_ref,
                            a_ref, *, action_size):
    # Fused argmax epilogue: only (tb, 1) int32 leaves VMEM instead of the
    # padded (tb, 128) f32 Q-value tile -> removes ~99% of output HBM bytes.
    q = _mlp(x_ref[...], w1_ref, b1_ref, w2_ref, b2_ref, w3_ref, b3_ref)  # f32
    lane = lax.broadcasted_iota(jnp.int32, q.shape, 1)
    neg = jnp.float32(jnp.finfo(jnp.float32).min)
    qm = jnp.where(lane < action_size, q, neg)            # mask padded actions
    qmax = jnp.max(qm, axis=-1, keepdims=True)            # lane reduce (XLU)
    lane_f = lane.astype(jnp.float32)
    big = jnp.float32(q.shape[-1])
    idx = jnp.min(jnp.where(qm == qmax, lane_f, big), axis=-1, keepdims=True)
    a_ref[...] = idx.astype(a_ref.dtype)                  # first max = argmax


def _run(kernel, x, kparams, out_cols, out_dtype, block_b):
    """Shared tiling / pallas_call plumbing for both output heads."""
    B, S = x.shape
    w1, b1 = kparams["w1"], kparams["b1"]
    w2, b2 = kparams["w2"], kparams["b2"]
    w3, b3 = kparams["w3"], kparams["b3"]
    x = x.astype(w1.dtype)

    # Tile: multiple of 8, capped at block_b, and sized so moderate batches
    # give >=2 grid steps (keeps both v7x TensorCores busy via "parallel").
    tb = min(block_b, max(SUBLANE, _round_up(pl.cdiv(B, 2), SUBLANE)))
    grid = (pl.cdiv(B, tb),)   # ragged tail handled by Pallas (no jnp.pad copy)

    flops = 2 * B * (w1.shape[0] * w1.shape[1]
                     + w2.shape[0] * w2.shape[1]
                     + w3.shape[0] * w3.shape[1])
    bytes_accessed = (B * S * x.dtype.itemsize
                      + B * out_cols * jnp.dtype(out_dtype).itemsize
                      + sum(int(a.size) * a.dtype.itemsize
                            for a in (w1, b1, w2, b2, w3, b3)))

    return pl.pallas_call(
        kernel,
        out_shape=jax.ShapeDtypeStruct((B, out_cols), out_dtype),
        grid=grid,
        in_specs=[
            pl.BlockSpec((tb, S), lambda i: (i, 0)),    # batch-tiled input
            pl.BlockSpec(w1.shape, lambda i: (0, 0)),   # weights/biases stay
            pl.BlockSpec(b1.shape, lambda i: (0, 0)),   # VMEM-resident across
            pl.BlockSpec(w2.shape, lambda i: (0, 0)),   # grid steps (constant
            pl.BlockSpec(b2.shape, lambda i: (0, 0)),   # block index => no
            pl.BlockSpec(w3.shape, lambda i: (0, 0)),   # re-DMA)
            pl.BlockSpec(b3.shape, lambda i: (0, 0)),
        ],
        out_specs=pl.BlockSpec((tb, out_cols), lambda i: (i, 0)),
        compiler_params=pltpu.CompilerParams(
            dimension_semantics=("parallel",)),         # megacore-shard batch
        cost_estimate=pl.CostEstimate(
            flops=int(flops), transcendentals=0,
            bytes_accessed=int(bytes_accessed)),
    )(x, w1, b1, w2, b2, w3, b3)


def dnn_sarsa_forward(x, kparams, *, action_size, block_b=512,
                      out_dtype=jnp.float32):
    """Q-values for x: [B, state_size] -> [B, action_size].
    Matches the PyTorch module's forward. Pass out_dtype=jnp.bfloat16 to halve
    the dominant output HBM stream when exactness is not required."""
    n_out = kparams["w3"].shape[1]                     # lane-padded (mult of 128)
    out = _run(dnn_sarsa_kernel, x, kparams, n_out, out_dtype, block_b)
    return out[:, :action_size]


def dnn_sarsa_greedy_action(x, kparams, *, action_size, block_b=512):
    """Fused greedy policy: argmax_a Q(x, a) -> [B] int32 actions (argmax
    epilogue inside the kernel, so Q-values never round-trip through HBM)."""
    kern = functools.partial(dnn_sarsa_greedy_kernel, action_size=action_size)
    idx = _run(kern, x, kparams, 1, jnp.int32, block_b)
    return idx[:, 0]
    # TODO(synk): epsilon-greedy exploration could also be fused via
    # pltpu.prng_seed/prng_random_bits if the sampling policy moves on-device.


def prepare_kernel_params(params, *, compute_dtype=jnp.float32):
    """One-time relayout of PyTorch-layout params ([out,in] weights, [out]
    biases) into kernel layout: [in,out] weights (compute_dtype), (1,out) f32
    biases. Hidden dims and the output head are zero-padded to 128 lanes so all
    three matmuls / intermediates are full-lane; zero pads are numerically
    inert (ReLU(0)=0). Use compute_dtype=jnp.bfloat16 on v6e/v7x for 2x MXU
    density and half the x DMA bytes (f32 accumulation preserved)."""
    state_size = params["fc1_w"].shape[1]
    action_size = params["out_w"].shape[0]
    h1p = _round_up(HIDDEN1, LANE)                        # 50  -> 128
    h2p = _round_up(HIDDEN2, LANE)                        # 100 -> 128
    n_out = _round_up(max(action_size, LANE), LANE)       # 4   -> 128

    w1 = jnp.zeros((state_size, h1p), jnp.float32).at[:, :HIDDEN1].set(
        params["fc1_w"].T)
    b1 = jnp.zeros((1, h1p), jnp.float32).at[:, :HIDDEN1].set(params["fc1_b"])
    w2 = jnp.zeros((h1p, h2p), jnp.float32).at[:HIDDEN1, :HIDDEN2].set(
        params["fc2_w"].T)
    b2 = jnp.zeros((1, h2p), jnp.float32).at[:, :HIDDEN2].set(params["fc2_b"])
    w3 = jnp.zeros((h2p, n_out), jnp.float32).at[:HIDDEN2, :action_size].set(
        params["out_w"].T)
    b3 = jnp.zeros((1, n_out), jnp.float32).at[:, :action_size].set(
        params["out_b"])
    return {
        "w1": w1.astype(compute_dtype), "b1": b1,
        "w2": w2.astype(compute_dtype), "b2": b2,
        "w3": w3.astype(compute_dtype), "b3": b3,
    }


def init_params(key, state_size, action_size):
    """Deterministic init matching PyTorch nn.Linear shapes (weights [out,in])."""
    def linear_init(k, fan_in, fan_out):
        kw, kb = jax.random.split(k)
        bound = 1.0 / jnp.sqrt(fan_in)
        w = jax.random.uniform(kw, (fan_out, fan_in), jnp.float32, -bound, bound)
        b = jax.random.uniform(kb, (fan_out,), jnp.float32, -bound, bound)
        return w, b

    k1, k2, k3 = jax.random.split(key, 3)
    fc1_w, fc1_b = linear_init(k1, state_size, HIDDEN1)
    fc2_w, fc2_b = linear_init(k2, HIDDEN1, HIDDEN2)
    out_w, out_b = linear_init(k3, HIDDEN2, action_size)
    return {
        "fc1_w": fc1_w, "fc1_b": fc1_b,
        "fc2_w": fc2_w, "fc2_b": fc2_b,
        "out_w": out_w, "out_b": out_b,
    }


def reference_forward(x, params):
    h1 = jnp.maximum(x @ params["fc1_w"].T + params["fc1_b"], 0.0)
    h2 = jnp.maximum(h1 @ params["fc2_w"].T + params["fc2_b"], 0.0)
    return h2 @ params["out_w"].T + params["out_b"]


if __name__ == "__main__":
    batch = 2
    state_size = 16
    action_size = 4

    key = jax.random.PRNGKey(0)
    kx, kp = jax.random.split(key)
    x = jax.random.normal(kx, (batch, state_size), jnp.float32)
    params = init_params(kp, state_size, action_size)

    # One-time relayout (hoisted off the per-call path). f32 here for the
    # bit-exact check; use compute_dtype=jnp.bfloat16 in production on v6e/v7x.
    kparams = prepare_kernel_params(params)

    fwd = jax.jit(functools.partial(dnn_sarsa_forward, action_size=action_size))
    act = jax.jit(functools.partial(dnn_sarsa_greedy_action,
                                    action_size=action_size))

    out = jax.block_until_ready(fwd(x, kparams))
    actions = jax.block_until_ready(act(x, kparams))

    ref = reference_forward(x, params)
    assert out.shape == (batch, action_size)
    assert jnp.allclose(out, ref, atol=1e-5, rtol=1e-5), "Q-value mismatch vs JAX reference"
    assert jnp.array_equal(actions, jnp.argmax(ref, axis=-1).astype(jnp.int32)), \
        "greedy action mismatch vs JAX reference"
    print("KERNEL_OK")
</pallas_src>

<mosaic_0001>
module attributes {stable_mosaic.version = 11 : i64} {
  func.func @dnn_sarsa_kernel(%arg0: i32, %arg1: memref<8x16xf32, #tpu.memory_space<vmem>>, %arg2: memref<16x128xf32, #tpu.memory_space<vmem>>, %arg3: memref<1x128xf32, #tpu.memory_space<vmem>>, %arg4: memref<128x128xf32, #tpu.memory_space<vmem>>, %arg5: memref<1x128xf32, #tpu.memory_space<vmem>>, %arg6: memref<128x128xf32, #tpu.memory_space<vmem>>, %arg7: memref<1x128xf32, #tpu.memory_space<vmem>>, %arg8: memref<8x128xf32, #tpu.memory_space<vmem>>) attributes {dimension_semantics = [#tpu.dimension_semantics<parallel>], iteration_bounds = array<i64: 1>, scalar_prefetch = 0 : i64, scratch_operands = 0 : i64, tpu.core_type = #tpu.core_type<tc>, window_params = [{transform_indices = @transform_0, window_bounds = array<i64: 8, 16>}, {pipeline_mode = #tpu.pipeline_mode<synchronous>, transform_indices = @transform_1, window_bounds = array<i64: 16, 128>}, {pipeline_mode = #tpu.pipeline_mode<synchronous>, transform_indices = @transform_2, window_bounds = array<i64: 1, 128>}, {pipeline_mode = #tpu.pipeline_mode<synchronous>, transform_indices = @transform_3, window_bounds = array<i64: 128, 128>}, {pipeline_mode = #tpu.pipeline_mode<synchronous>, transform_indices = @transform_4, window_bounds = array<i64: 1, 128>}, {pipeline_mode = #tpu.pipeline_mode<synchronous>, transform_indices = @transform_5, window_bounds = array<i64: 128, 128>}, {pipeline_mode = #tpu.pipeline_mode<synchronous>, transform_indices = @transform_6, window_bounds = array<i64: 1, 128>}, {transform_indices = @transform_7, window_bounds = array<i64: 8, 128>}]} {
    %c0 = arith.constant 0 : index
    %c0_0 = arith.constant 0 : index
    %0 = vector.load %arg1[%c0, %c0_0] : memref<8x16xf32, #tpu.memory_space<vmem>>, vector<8x16xf32>
    %c0_1 = arith.constant 0 : index
    %c0_2 = arith.constant 0 : index
    %1 = vector.load %arg2[%c0_1, %c0_2] : memref<16x128xf32, #tpu.memory_space<vmem>>, vector<16x128xf32>
    %cst = arith.constant dense<0.000000e+00> : vector<8x128xf32>
    %2 = tpu.matmul %0, %1, %cst {dimension_numbers = #tpu.dot_dimension_numbers<[1], [0], [0], [1], [0, 0, 1, 1], [], []>} : vector<8x16xf32>, vector<16x128xf32>, vector<8x128xf32> -> vector<8x128xf32>
    %c0_3 = arith.constant 0 : index
    %c0_4 = arith.constant 0 : index
    %3 = vector.load %arg3[%c0_3, %c0_4] : memref<1x128xf32, #tpu.memory_space<vmem>>, vector<1x128xf32>
    %4 = vector.broadcast %3 : vector<1x128xf32> to vector<8x128xf32>
    %5 = arith.addf %2, %4 : vector<8x128xf32>
    %cst_5 = arith.constant 0.000000e+00 : f32
    %6 = vector.broadcast %cst_5 : f32 to vector<8x128xf32>
    %7 = arith.maximumf %5, %6 : vector<8x128xf32>
    %c0_6 = arith.constant 0 : index
    %c0_7 = arith.constant 0 : index
    %8 = vector.load %arg4[%c0_6, %c0_7] : memref<128x128xf32, #tpu.memory_space<vmem>>, vector<128x128xf32>
    %cst_8 = arith.constant dense<0.000000e+00> : vector<8x128xf32>
    %9 = tpu.matmul %7, %8, %cst_8 {dimension_numbers = #tpu.dot_dimension_numbers<[1], [0], [0], [1], [0, 0, 1, 1], [], []>} : vector<8x128xf32>, vector<128x128xf32>, vector<8x128xf32> -> vector<8x128xf32>
    %c0_9 = arith.constant 0 : index
    %c0_10 = arith.constant 0 : index
    %10 = vector.load %arg5[%c0_9, %c0_10] : memref<1x128xf32, #tpu.memory_space<vmem>>, vector<1x128xf32>
    %11 = vector.broadcast %10 : vector<1x128xf32> to vector<8x128xf32>
    %12 = arith.addf %9, %11 : vector<8x128xf32>
    %cst_11 = arith.constant 0.000000e+00 : f32
    %13 = vector.broadcast %cst_11 : f32 to vector<8x128xf32>
    %14 = arith.maximumf %12, %13 : vector<8x128xf32>
    %c0_12 = arith.constant 0 : index
    %c0_13 = arith.constant 0 : index
    %15 = vector.load %arg6[%c0_12, %c0_13] : memref<128x128xf32, #tpu.memory_space<vmem>>, vector<128x128xf32>
    %cst_14 = arith.constant dense<0.000000e+00> : vector<8x128xf32>
    %16 = tpu.matmul %14, %15, %cst_14 {dimension_numbers = #tpu.dot_dimension_numbers<[1], [0], [0], [1], [0, 0, 1, 1], [], []>} : vector<8x128xf32>, vector<128x128xf32>, vector<8x128xf32> -> vector<8x128xf32>
    %c0_15 = arith.constant 0 : index
    %c0_16 = arith.constant 0 : index
    %17 = vector.load %arg7[%c0_15, %c0_16] : memref<1x128xf32, #tpu.memory_space<vmem>>, vector<1x128xf32>
    %18 = vector.broadcast %17 : vector<1x128xf32> to vector<8x128xf32>
    %19 = arith.addf %16, %18 : vector<8x128xf32>
    %c0_17 = arith.constant 0 : index
    %c0_18 = arith.constant 0 : index
    %20 = vector.load %arg8[%c0_17, %c0_18] : memref<8x128xf32, #tpu.memory_space<vmem>>, vector<8x128xf32>
    tpu.vector_store %arg8[%c0_17, %c0_18], %19 {strides = array<i32>} : memref<8x128xf32, #tpu.memory_space<vmem>>, vector<8x128xf32>,
    return
  }
  func.func @transform_0(%arg0: i32) -> (i32, i32) {
    %c0_i32 = arith.constant 0 : i32
    %c0_i32_0 = arith.constant 0 : i32
    return %arg0, %c0_i32 : i32, i32
  }
  func.func @transform_1(%arg0: i32) -> (i32, i32) {
    %c0_i32 = arith.constant 0 : i32
    %c0_i32_0 = arith.constant 0 : i32
    %c0_i32_1 = arith.constant 0 : i32
    return %c0_i32, %c0_i32_0 : i32, i32
  }
  func.func @transform_2(%arg0: i32) -> (i32, i32) {
    %c0_i32 = arith.constant 0 : i32
    %c0_i32_0 = arith.constant 0 : i32
    %c0_i32_1 = arith.constant 0 : i32
    return %c0_i32, %c0_i32_0 : i32, i32
  }
  func.func @transform_3(%arg0: i32) -> (i32, i32) {
    %c0_i32 = arith.constant 0 : i32
    %c0_i32_0 = arith.constant 0 : i32
    %c0_i32_1 = arith.constant 0 : i32
    return %c0_i32, %c0_i32_0 : i32, i32
  }
  func.func @transform_4(%arg0: i32) -> (i32, i32) {
    %c0_i32 = arith.constant 0 : i32
    %c0_i32_0 = arith.constant 0 : i32
    %c0_i32_1 = arith.constant 0 : i32
    return %c0_i32, %c0_i32_0 : i32, i32
  }
  func.func @transform_5(%arg0: i32) -> (i32, i32) {
    %c0_i32 = arith.constant 0 : i32
    %c0_i32_0 = arith.constant 0 : i32
    %c0_i32_1 = arith.constant 0 : i32
    return %c0_i32, %c0_i32_0 : i32, i32
  }
  func.func @transform_6(%arg0: i32) -> (i32, i32) {
    %c0_i32 = arith.constant 0 : i32
    %c0_i32_0 = arith.constant 0 : i32
    %c0_i32_1 = arith.constant 0 : i32
    return %c0_i32, %c0_i32_0 : i32, i32
  }
  func.func @transform_7(%arg0: i32) -> (i32, i32) {
    %c0_i32 = arith.constant 0 : i32
    %c0_i32_0 = arith.constant 0 : i32
    return %arg0, %c0_i32 : i32, i32
  }
}

</mosaic_0001>

<bundles_post_ra>
// kernel: dnn_sarsa_forward.1
= control target key start
LH: loop header
LB: loop body
LE: loop exit
PB: predicated region body
PF: predicated region fallthrough
CT: control target
= control target key end

     0   :  { %12 = vsyncpa [#allocation3], 0  ;;  %s741_s0 = inlined_call_operand.hbm [shape: f32[2,16], index: 0, kind: input, shape index: {}]   ;;  %s742_s1 = inlined_call_operand.hbm [shape: f32[16,128], index: 1, kind: input, shape index: {}]   ;;  %s743_s2 = inlined_call_operand.vmem [shape: f32[1,128], index: 2, kind: input, shape index: {}]   ;;  %s744_s3 = inlined_call_operand.hbm [shape: f32[128,128], index: 3, kind: input, shape index: {}]   ;;  %s745_s4 = inlined_call_operand.vmem [shape: f32[1,128], index: 4, kind: input, shape index: {}]   ;;  %s746_s5 = inlined_call_operand.hbm [shape: f32[128,128], index: 5, kind: input, shape index: {}]   ;;  %s747_s6 = inlined_call_operand.vmem [shape: f32[1,128], index: 6, kind: input, shape index: {}]   ;;  %s748_s7 = inlined_call_operand.hbm [shape: f32[2,128], index: 7, kind: output, shape index: {}]  }
   0x1   :  { %13 = vsyncpa [#allocation6], 0 }
   0x2   :  { %14 = vsyncpa [#allocation9], 0 }
   0x3   :  { %15 = vsyncpa [#allocation4], 0 }
   0x4   :  { %20 = vsyncadd [#allocation3], 96  ;;  %s611_s24 = smov [#allocation5]  }
   0x5   :  { %s33_s25 = sshll.u32 %s611_s24, 4  ;;  %s34_s25 = int_to_ptr.vmem [resolvable:$true] %s33_s25 }
   0x6   :  { %s511_s26 = scalar_lea.vmem %s34_s25, 256  ;;  %p516_p1 = scmp.lt.s32.totalorder %s34_s25, %s34_s25 }
   0x7   :  { %p512_p0 = scmp.ne.s32.totalorder %s34_s25, %s511_s26  ;;  %p517_p2 = scmp.lt.s32.totalorder %s511_s26, %s511_s26 }
   0x9   :  { %p518_p3 = por %p517_p2, %p516_p1 }
   0xb   :  { %p519_p4 = pnand %p518_p3, %p512_p0 }
   0xd   :  { %522 = shalt.err (!%p519_p4)
}
   0xe   :  { %s612_s27 = smov 128   ;;  %s613_s28 = smov 8  }
   0xf   :  { %39 = dma.hbm_to_vmem [thread:$0]  %s742_s1, 256, %s34_s25, [#allocation6], %s612_s27, %s612_s27, %s613_s28  }
  0x10   :  { %s614_s8 = smov [#allocation2]  }
  0x11   :  { %s21_s9 = sshll.u32 %s614_s8, 4  ;;  %s22_s9 = int_to_ptr.vmem [resolvable:$true] %s21_s9 }
  0x12   :  { %s531_s10 = scalar_lea.vmem %s22_s9, 32  ;;  %s535_s11 = scalar_lea.vmem %s22_s9, 128 }
  0x13   :  { %p532_p5 = scmp.ne.s32.totalorder %s22_s9, %s531_s10  ;;  %p536_p6 = scmp.lt.s32.totalorder %s22_s9, %s22_s9 }
  0x14   :  { %p537_p7 = scmp.lt.s32.totalorder %s535_s11, %s531_s10 }
  0x16   :  { %p538_p8 = por %p537_p7, %p536_p6 }
  0x18   :  { %p539_p9 = pnand %p538_p8, %p532_p5 }
  0x1a   :  { %542 = shalt.err (!%p539_p9)
}
  0x1b   :  { %s615_s12 = smov 32   ;;  %s616_s13 = smov 2  }
  0x1c   :  { %27 = dma.hbm_to_vmem [thread:$0]  %s741_s0, 32, %s22_s9, [#allocation3], %s615_s12, %s615_s12, %s616_s13  }
  0x1d   :  { %s617_s1 = smov [#allocation7]   ;;  %s618_s17 = smov [#allocation8]  }
  0x1e   :  { %s47_s16 = sshll.u32 %s617_s1, 4  ;;  %s61_s18 = sshll.u32 %s618_s17, 4  ;;  %s48_s16 = int_to_ptr.vmem [resolvable:$true] %s47_s16  ;;  %s62_s18 = int_to_ptr.vmem [resolvable:$true] %s61_s18 }
  0x1f   :  { %s551_s19 = scalar_lea.vmem %s48_s16, 2048  ;;  %p556_p11 = scmp.lt.s32.totalorder %s48_s16, %s48_s16 }
  0x20   :  { %p552_p10 = scmp.ne.s32.totalorder %s48_s16, %s551_s19  ;;  %p557_p12 = scmp.lt.s32.totalorder %s551_s19, %s551_s19 }
  0x22   :  { %p558_p13 = por %p557_p12, %p556_p11 }
  0x24   :  { %p559_p0 = pnand %p558_p13, %p552_p10 }
  0x26   :  { %562 = shalt.err (!%p559_p0)
}
  0x27   :  { %53 = dma.hbm_to_vmem [thread:$0]  %s744_s3, 2048, %s48_s16, [#allocation6], %s612_s27, %s612_s27, %s613_s28  }
  0x28   :  { %s571_s0 = scalar_lea.vmem %s62_s18, 2048  ;;  %p576_p2 = scmp.lt.s32.totalorder %s62_s18, %s62_s18 }
  0x29   :  { %p572_p1 = scmp.ne.s32.totalorder %s62_s18, %s571_s0  ;;  %p577_p3 = scmp.lt.s32.totalorder %s571_s0, %s571_s0 }
  0x2b   :  { %p578_p4 = por %p577_p3, %p576_p2 }
  0x2d   :  { %p579_p5 = pnand %p578_p4, %p572_p1 }
  0x2f   :  { %582 = shalt.err (!%p579_p5)
}
  0x30   :  { %67 = dma.hbm_to_vmem [thread:$0]  %s746_s5, 2048, %s62_s18, [#allocation9], %s612_s27, %s612_s27, %s613_s28  }
  0x31   :  { %603 = dma.done.wait [#allocation3], 128  }
  0x32   :  { %604 = vsyncadd [#allocation3], 4294967168 }
  0x33   :  { %605 = dma.done.wait [#allocation6], 2304  }
  0x34   :  { %606 = vsyncadd [#allocation6], 4294964992 }
  0x35   :  { %607 = dma.done.wait [#allocation9], 2048  }
  0x36   :  { %608 = vsyncadd [#allocation9], 4294965248  ;;  %v619_v0 = vmov 0.0   ;;  %vm620_vm0 = vmmov 0   ;;  %v84_v1 = vld [vmem:[#allocation5 + $0x8] sm:$0xff]  ;;  %v83_v2 = vld [vmem:[#allocation5] sm:$0xff] }
  0x37   :  { %415 = vmatprep.subr.mxu0 %v619_v0  ;;  %419 = vmatprep.mubr.msk.f32.mxu0 %vm620_vm0, %v619_v0  ;;  %v82_v3 = vld [vmem:[#allocation2] sm:$0xff]  ;;  %vm92_vm1 = vcmask 130048   ;;  %v182_v4 = vld [vmem:[#allocation7 + $0x78] sm:$0xff]  ;;  %v181_v5 = vld [vmem:[#allocation7 + $0x70] sm:$0xff] }
  0x38   :  { %422 = vmatprep.subr.mxu1 %v619_v0  ;;  %454 = vmatprep.mubr.msk.f32.mxu1 %vm620_vm0, %v619_v0  ;;  %v180_v6 = vld [vmem:[#allocation7 + $0x68] sm:$0xff]  ;;  %v179_v7 = vld [vmem:[#allocation7 + $0x60] sm:$0xff]  ;;  %v178_v8 = vld [vmem:[#allocation7 + $0x58] sm:$0xff] }
  0x39   :  { %416 = vmatpush3.msra.mxu0 %v84_v1  ;;  %423 = vmatpush3.msra.mxu1 %v182_v4  ;;  %v177_v9 = vld [vmem:[#allocation7 + $0x50] sm:$0xff]  ;;  %v176_v10 = vld [vmem:[#allocation7 + $0x48] sm:$0xff]  ;;  %v175_v11 = vld [vmem:[#allocation7 + $0x40] sm:$0xff] }
  0x3a   :  { %417 = vmatprep.subr.mxu0 %v619_v0  ;;  %424 = vmatprep.subr.mxu1 %v619_v0  ;;  %v174_v12 = vld [vmem:[#allocation7 + $0x38] sm:$0xff]  ;;  %v173_v13 = vld [vmem:[#allocation7 + $0x30] sm:$0xff]  ;;  %v172_v14 = vld [vmem:[#allocation7 + $0x28] sm:$0xff] }
  0x3b   :  { %418 = vmatpush3.msra.mxu0 %v83_v2  ;;  %425 = vmatpush3.msra.mxu1 %v181_v5  ;;  %v171_v15 = vld [vmem:[#allocation7 + $0x20] sm:$0xff]  ;;  %v170_v16 = vld [vmem:[#allocation7 + $0x18] sm:$0xff]  ;;  %v169_v17 = vld [vmem:[#allocation7 + $0x10] sm:$0xff] }
  0x3c   :  { %420 = vmatmul.mubr.msk.f32.vlgmr.msra.gmra.mxu0 %vm92_vm1, %v82_v3  ;;  %426 = vmatprep.subr.mxu1 %v619_v0  ;;  %v168_v18 = vld [vmem:[#allocation7 + $0x8] sm:$0xff]  ;;  %v167_v19 = vld [vmem:[#allocation7] sm:$0xff]  ;;  %v276_v20 = vld [vmem:[#allocation8 + $0x78] sm:$0xff] }
  0x3d   :  { %457 = vmatprep.subr.mxu0 %v619_v0  ;;  %427 = vmatpush3.msra.mxu1 %v180_v6  ;;  %v275_v21 = vld [vmem:[#allocation8 + $0x70] sm:$0xff]  ;;  %v274_v22 = vld [vmem:[#allocation8 + $0x68] sm:$0xff]  ;;  %v273_v23 = vld [vmem:[#allocation8 + $0x60] sm:$0xff] }
  0x3e   :  { %489 = vmatprep.mubr.msk.f32.mxu0 %vm620_vm0, %v619_v0  ;;  %428 = vmatprep.subr.mxu1 %v619_v0  ;;  %v272_v24 = vld [vmem:[#allocation8 + $0x58] sm:$0xff]  ;;  %v271_v25 = vld [vmem:[#allocation8 + $0x50] sm:$0xff]  ;;  %v270_v26 = vld [vmem:[#allocation8 + $0x48] sm:$0xff] }
  0x3f   :  { %429 = vmatpush3.msra.mxu1 %v179_v7  ;;  %458 = vmatpush3.msra.mxu0 %v276_v20  ;;  %v269_v27 = vld [vmem:[#allocation8 + $0x40] sm:$0xff]  ;;  %v268_v28 = vld [vmem:[#allocation8 + $0x38] sm:$0xff]  ;;  %v267_v29 = vld [vmem:[#allocation8 + $0x30] sm:$0xff] }
  0x40   :  { %430 = vmatprep.subr.mxu1 %v619_v0  ;;  %459 = vmatprep.subr.mxu0 %v619_v0  ;;  %v266_v30 = vld [vmem:[#allocation8 + $0x28] sm:$0xff]  ;;  %v265_v31 = vld [vmem:[#allocation8 + $0x20] sm:$0xff]  ;;  %v264_v32 = vld [vmem:[#allocation8 + $0x18] sm:$0xff] }
  0x41   :  { %431 = vmatpush3.msra.mxu1 %v178_v8  ;;  %460 = vmatpush3.msra.mxu0 %v275_v21  ;;  %v374_v33 = vld [vmem:[%s743_s2] ss:$0 sm:$0xff]  ;;  %v263_v38 = vld [vmem:[#allocation8 + $0x10] sm:$0xff]  ;;  %v261_v40 = vld [vmem:[#allocation8] sm:$0xff] }
  0x42   :  { %432 = vmatprep.subr.mxu1 %v619_v0  ;;  %461 = vmatprep.subr.mxu0 %v619_v0  ;;  %v262_v39 = vld [vmem:[#allocation8 + $0x8] sm:$0xff] }
  0x43   :  { %433 = vmatpush3.msra.mxu1 %v177_v9  ;;  %462 = vmatpush3.msra.mxu0 %v274_v22  ;;  %v376_v41 = vld [vmem:[%s745_s4] ss:$0 sm:$0xff] }
  0x44   :  { %434 = vmatprep.subr.mxu1 %v619_v0  ;;  %463 = vmatprep.subr.mxu0 %v619_v0  ;;  %v377_v46 = vld [vmem:[%s747_s6] ss:$0 sm:$0xff] }
  0x45   :  { %435 = vmatpush3.msra.mxu1 %v176_v10  ;;  %464 = vmatpush3.msra.mxu0 %v273_v23 }
  0x46   :  { %436 = vmatprep.subr.mxu1 %v619_v0  ;;  %465 = vmatprep.subr.mxu0 %v619_v0 }
  0x47   :  { %437 = vmatpush3.msra.mxu1 %v175_v11  ;;  %466 = vmatpush3.msra.mxu0 %v272_v24 }
  0x48   :  { %438 = vmatprep.subr.mxu1 %v619_v0  ;;  %467 = vmatprep.subr.mxu0 %v619_v0 }
  0x49   :  { %439 = vmatpush3.msra.mxu1 %v174_v12  ;;  %468 = vmatpush3.msra.mxu0 %v271_v25 }
  0x4a   :  { %440 = vmatprep.subr.mxu1 %v619_v0  ;;  %469 = vmatprep.subr.mxu0 %v619_v0 }
  0x4b   :  { %441 = vmatpush3.msra.mxu1 %v173_v13  ;;  %470 = vmatpush3.msra.mxu0 %v270_v26 }
  0x4c   :  { %442 = vmatprep.subr.mxu1 %v619_v0  ;;  %471 = vmatprep.subr.mxu0 %v619_v0 }
  0x4d   :  { %443 = vmatpush3.msra.mxu1 %v172_v14  ;;  %472 = vmatpush3.msra.mxu0 %v269_v27 }
  0x4e   :  { %444 = vmatprep.subr.mxu1 %v619_v0  ;;  %473 = vmatprep.subr.mxu0 %v619_v0 }
  0x4f   :  { %445 = vmatpush3.msra.mxu1 %v171_v15  ;;  %474 = vmatpush3.msra.mxu0 %v268_v28 }
  0x50   :  { %446 = vmatprep.subr.mxu1 %v619_v0  ;;  %475 = vmatprep.subr.mxu0 %v619_v0 }
  0x51   :  { %447 = vmatpush3.msra.mxu1 %v170_v16  ;;  %476 = vmatpush3.msra.mxu0 %v267_v29 }
  0x52   :  { %448 = vmatprep.subr.mxu1 %v619_v0  ;;  %477 = vmatprep.subr.mxu0 %v619_v0 }
  0x53   :  { %449 = vmatpush3.msra.mxu1 %v169_v17  ;;  %478 = vmatpush3.msra.mxu0 %v266_v30 }
  0x54   :  { %450 = vmatprep.subr.mxu1 %v619_v0  ;;  %479 = vmatprep.subr.mxu0 %v619_v0 }
  0x55   :  { %451 = vmatpush3.msra.mxu1 %v168_v18  ;;  %480 = vmatpush3.msra.mxu0 %v265_v31 }
  0x56   :  { %452 = vmatprep.subr.mxu1 %v619_v0  ;;  %481 = vmatprep.subr.mxu0 %v619_v0 }
  0x57   :  { %453 = vmatpush3.msra.mxu1 %v167_v19  ;;  %482 = vmatpush3.msra.mxu0 %v264_v32 }
  0x58   :  { %483 = vmatprep.subr.mxu0 %v619_v0 }
  0x59   :  { %484 = vmatpush3.msra.mxu0 %v263_v38 }
  0x5a   :  { %485 = vmatprep.subr.mxu0 %v619_v0 }
  0x5b   :  { %486 = vmatpush3.msra.mxu0 %v262_v39 }
  0x5c   :  { %487 = vmatprep.subr.mxu0 %v619_v0 }
  0x5d   :  { %488 = vmatpush3.msra.mxu0 %v261_v40 }
  0xfc   :  { %v162_v34 = vpop.f32.mrf.mxu0 }
  0xfd   :  { %v163_v35 = vadd.f32 %v374_v33, %v162_v34 }
  0xfe   :  { %v421_v36 = vpop.f32.mrf.mxu0 }
  0xff   :  { %v166_v37 = vmax.f32 %v163_v35, 0.0 }
 0x101   :  { %455 = vmatmul.mubr.f32.vlgmr.msra.gmra.mxu1 %v166_v37 }
 0x1c1   :  { %v256_v42 = vpop.f32.mrf.mxu1 }
 0x1c2   :  { %v257_v43 = vadd.f32 %v376_v41, %v256_v42 }
 0x1c3   :  { %v456_v44 = vpop.f32.mrf.mxu1 }
 0x1c4   :  { %v260_v45 = vmax.f32 %v257_v43, 0.0 }
 0x1c6   :  { %490 = vmatmul.mubr.f32.vlgmr.msra.gmra.mxu0 %v260_v45 }
 0x286   :  { %v350_v47 = vpop.f32.mrf.mxu0 }
 0x287   :  { %v351_v48 = vadd.f32 %v377_v46, %v350_v47 }
 0x288   :  { %v491_v49 = vpop.f32.mrf.mxu0 }
 0x289   :  { %354 = vst [vmem:[#allocation10] sm:$0xff] %v351_v48 }
 0x28a   :  { %359 = vsyncadd [#allocation4], 96  ;;  %s621_s27 = smov [#allocation10]  }
 0x28b   :  { %s360_s28 = sshll.u32 %s621_s27, 4  ;;  %s361_s28 = int_to_ptr.vmem [resolvable:$true] %s360_s28 }
 0x28c   :  { %s583_s29 = scalar_lea.vmem %s361_s28, 32  ;;  %s587_s4 = scalar_lea.vmem %s361_s28, 128 }
 0x28d   :  { %p584_p6 = scmp.ne.s32.totalorder %s361_s28, %s583_s29  ;;  %p588_p7 = scmp.lt.s32.totalorder %s361_s28, %s361_s28 }
 0x28e   :  { %p589_p8 = scmp.lt.s32.totalorder %s587_s4, %s583_s29 }
 0x290   :  { %p590_p9 = por %p589_p8, %p588_p7 }
 0x292   :  { %p591_p10 = pnand %p590_p9, %p584_p6 }
 0x294   :  { %594 = shalt.err (!%p591_p10)
}
 0x295   :  { %366 = dma.vmem_to_hbm [thread:$0]  %s361_s28, 32, %s748_s7, [#allocation4], %s615_s12, %s615_s12, %s616_s13  }
 0x296   :  { %609 = dma.done.wait [#allocation4], 128  }
 0x297   :  { %610 = vsyncadd [#allocation4], 4294967168 }
 0x298   :  { %370 = vsyncpa [#allocation3], 1 }
 0x299   :  { %371 = vsyncpa [#allocation6], 1 }
 0x29a   :  { %372 = vsyncpa [#allocation9], 1 }
 0x29b   :  { %373 = vsyncpa [#allocation4], 1 }

</bundles_post_ra>
